<compile_context>
chip_gen: v5e
topology: v5e:2x2
jax: 0.10.0
libtpu: 0.0.40
codegen_flags: <defaults>
</compile_context>

<pallas_src>
import functools

import jax
import jax.numpy as jnp
from jax import lax
from jax.experimental import pallas as pl
from jax.experimental.pallas import tpu as pltpu


def _convt_kernel(x_ref, xh_ref, w_ref, p_ref, b_ref, o_ref, *,
                  jmax, halo, stride, c_out, cw, hw, n_total, needs_mask):
    # x_ref:  (1, C_in, tile_n)           current input time tile
    # xh_ref: (1, C_in, hw)               previous tile's last hw input columns (halo)
    # w_ref:  (jmax, stride*C_out, C_in)  prepacked per-tap weights (zero beyond K)
    # p_ref:  (stride*cw, cw*stride)      0/1 phase-interleave matrix
    # b_ref:  (C_out, 1)                  bias (f32)
    # o_ref:  (1, C_out, tile_n*stride)   interleaved output tile
    ti = pl.program_id(1)
    x_t = x_ref[0]                                   # (C_in, tile_n)
    tile_n = x_t.shape[-1]

    if needs_mask:
        # Last tile overhangs the input: zero out-of-range columns so stale VMEM garbage
        # can never reach the interleave matmul (0 * NaN protection); cheap VPU pass.
        valid = n_total - ti * tile_n
        lane = lax.broadcasted_iota(jnp.int32, x_t.shape, 1)
        x_t = jnp.where(lane < valid, x_t, jnp.zeros_like(x_t))

    # ---- causal transposed conv: jmax accumulated MXU matmuls, f32 accumulation ----
    res = jnp.dot(w_ref[0], x_t, preferred_element_type=jnp.float32)   # (stride*C_out, tile_n)
    if halo > 0:
        h = xh_ref[0]                                # (C_in, hw)
        h = jnp.where(ti > 0, h, jnp.zeros_like(h))  # zero left context at the first tile
        window = jnp.concatenate([h, x_t], axis=-1)  # (C_in, hw + tile_n), aligned pieces
        for j in range(1, jmax):
            res = res + jnp.dot(w_ref[j], window[:, hw - j: hw - j + tile_n],
                                preferred_element_type=jnp.float32)

    bias = b_ref[...].astype(jnp.float32)            # (C_out, 1) broadcast over time

    if stride == 1:                                  # no interleave needed
        o_ref[0] = (res + bias).astype(o_ref.dtype)
        return

    # ---- in-kernel phase interleave: out[co, q*stride + r] = res[r*C_out + co, q] ----
    p_mat = p_ref[...]
    for c in range(tile_n // cw):
        cb = c * cw
        rmat = jnp.concatenate(
            [res[r * c_out:(r + 1) * c_out, cb:cb + cw] for r in range(stride)],
            axis=-1)                                 # (C_out, stride*cw)
        chunk = jnp.dot(rmat.astype(p_mat.dtype), p_mat,
                        preferred_element_type=jnp.float32)      # (C_out, cw*stride)
        o_ref[0, :, cb * stride:(cb + cw) * stride] = (chunk + bias).astype(o_ref.dtype)


def causal_conv_transpose1d(x, weight, bias, *, stride, tile_n=512, mxu_dtype=None):
    """x: (B, C_in, T), weight: (C_in, C_out, K) [torch ConvTranspose1d layout],
    bias: (C_out,).  Returns ConvTranspose1d(x)[..., :T*stride] (defaults: padding=0,
    output_padding=0, dilation=1, groups=1).  `mxu_dtype=jnp.bfloat16` casts the MXU
    operands (x, weights, P) for higher throughput / lower VMEM at bf16 precision."""
    b, c_in, n = x.shape
    w_c_in, c_out, k = weight.shape
    assert w_c_in == c_in, (w_c_in, c_in)
    assert stride >= 1 and k >= 1

    out_dtype = x.dtype
    cdt = jnp.dtype(mxu_dtype) if mxu_dtype is not None else x.dtype

    jmax = -(-k // stride)          # taps per phase
    halo = jmax - 1                 # left-context samples needed

    # ---- time tiling: lane-dense tiles (multiple of 128) or the full (small) axis ----
    if n < 128:
        tile_n = n
        hw = n                      # halo window width
        cw = n                      # interleave chunk width
    else:
        req = max(128, (int(tile_n) // 128) * 128)
        tile_n = min(req, (n // 128) * 128)
        hw = 128
        cw = 128
    nt = pl.cdiv(n, tile_n)
    needs_mask = (n % tile_n) != 0
    ratio = tile_n // hw

    assert halo <= hw, (
        f"left context ({halo}) exceeds the halo window ({hw}); this kernel_size/stride "
        "combination is not supported for this input length")

    # ---- weight / bias / interleave-matrix prepack (tiny, once, in XLA) ----
    # w_all[j, r*C_out + co, ci] = weight[ci, co, j*stride + r]  (0 for taps >= K)
    w_pad = jnp.pad(weight, ((0, 0), (0, 0), (0, jmax * stride - k)))
    w_all = jnp.transpose(w_pad.reshape(c_in, c_out, jmax, stride),
                          (2, 3, 1, 0)).reshape(jmax, stride * c_out, c_in).astype(cdt)
    bias2d = bias.reshape(c_out, 1).astype(jnp.float32)

    # P[r*cw + q, q*stride + r] = 1 : maps phase-major chunk rows to interleaved lanes.
    rows = jnp.arange(stride * cw)
    cols = (rows % cw) * stride + rows // cw
    p_mat = (cols[:, None] == jnp.arange(cw * stride)[None, :]).astype(cdt)

    x_c = x.astype(cdt)

    kernel = functools.partial(
        _convt_kernel, jmax=jmax, halo=halo, stride=stride, c_out=c_out,
        cw=cw, hw=hw, n_total=n, needs_mask=needs_mask)

    conv_flops = 2 * b * n * jmax * c_in * stride * c_out
    perm_flops = 0 if stride == 1 else 2 * b * n * stride * stride * cw * c_out
    bytes_accessed = (x_c.size * x_c.dtype.itemsize
                      + w_all.size * w_all.dtype.itemsize
                      + p_mat.size * p_mat.dtype.itemsize
                      + b * c_out * n * stride * jnp.dtype(out_dtype).itemsize)

    out = pl.pallas_call(
        kernel,
        out_shape=jax.ShapeDtypeStruct((b, c_out, n * stride), out_dtype),
        grid_spec=pltpu.PrefetchScalarGridSpec(
            num_scalar_prefetch=0,
            grid=(b, nt),
            in_specs=[
                # current input tile
                pl.BlockSpec((1, c_in, tile_n), lambda bi, ti: (bi, 0, ti)),
                # previous tile's last hw columns (overlapping halo block; masked at ti==0)
                pl.BlockSpec((1, c_in, hw),
                             lambda bi, ti: (bi, 0, jnp.maximum(ti * ratio - 1, 0))),
                pl.BlockSpec((jmax, stride * c_out, c_in), lambda bi, ti: (0, 0, 0)),
                pl.BlockSpec((stride * cw, cw * stride), lambda bi, ti: (0, 0)),
                pl.BlockSpec((c_out, 1), lambda bi, ti: (0, 0)),
            ],
            out_specs=pl.BlockSpec((1, c_out, tile_n * stride),
                                   lambda bi, ti: (bi, 0, ti)),
        ),
        compiler_params=pltpu.CompilerParams(
            # no loop-carried state -> both axes parallel (megacore / multi-TC friendly)
            dimension_semantics=("parallel", "parallel"),
            vmem_limit_bytes=48 * 1024 * 1024,
        ),
        cost_estimate=pl.CostEstimate(
            flops=int(conv_flops + perm_flops),
            transcendentals=0,
            bytes_accessed=int(bytes_accessed)),
    )(x_c, x_c, w_all, p_mat, bias2d)

    out_len = min(n * stride, (n - 1) * stride + k)   # torch slicing semantics
    if out_len < n * stride:                          # only when K < stride
        out = out[:, :, :out_len]
    return out


def conv_transpose1d_ref(x, weight, bias, stride):
    """Pure-JAX reference with exact nn.ConvTranspose1d semantics + [..., :n*stride]."""
    b, c_in, n = x.shape
    c_out, k = weight.shape[1], weight.shape[2]
    full = (n - 1) * stride + k
    out = jnp.zeros((b, c_out, full), dtype=jnp.float32)
    xf = x.astype(jnp.float32)
    for kk in range(k):
        contrib = jnp.einsum("bci,co->boi", xf, weight[:, :, kk].astype(jnp.float32))
        out = out.at[:, :, kk: kk + n * stride: stride].add(contrib)
    out = out + bias.astype(jnp.float32)[None, :, None]
    return out[:, :, : n * stride].astype(x.dtype)


if __name__ == "__main__":
    def run_case(key, *, B, C_in, C_out, K, stride, T, tile_n=512,
                 dtype=jnp.float32, atol=2e-4, rtol=2e-4):
        kx, kw, kb = jax.random.split(key, 3)
        x = (jax.random.normal(kx, (B, C_in, T), dtype=jnp.float32)).astype(dtype)
        # torch ConvTranspose1d weight layout: (in_channels, out_channels, K)
        weight = (jax.random.normal(kw, (C_in, C_out, K), dtype=jnp.float32) * 0.1).astype(dtype)
        bias = (jax.random.normal(kb, (C_out,), dtype=jnp.float32) * 0.1).astype(dtype)

        out = causal_conv_transpose1d(x, weight, bias, stride=stride, tile_n=tile_n)
        out = jax.block_until_ready(out)

        ref = conv_transpose1d_ref(x, weight, bias, stride)
        assert out.shape == ref.shape, (out.shape, ref.shape)
        o32 = out.astype(jnp.float32)
        r32 = ref.astype(jnp.float32)
        err = float(jnp.max(jnp.abs(o32 - r32)))
        assert jnp.allclose(o32, r32, atol=atol, rtol=rtol), err

    key = jax.random.PRNGKey(0)
    k1, k2, k3, k4 = jax.random.split(key, 4)
    # Typical SoundStream decoder config (K = 2*stride), single small time tile.
    run_case(k1, B=2, C_in=4, C_out=8, K=4, stride=2, T=16)
    # Multi time tile: overlapping-block halo, zero-padded taps (K % stride != 0),
    # ragged last input tile + masked output overhang.
    run_case(k2, B=2, C_in=8, C_out=4, K=7, stride=3, T=250, tile_n=128)
    # K < stride: halo == 0 path + truncated tail (output shorter than n*stride).
    run_case(k3, B=1, C_in=4, C_out=6, K=2, stride=4, T=16)
    # bf16 MXU operands end to end (review item: bf16 operands, f32 accumulation).
    run_case(k4, B=2, C_in=8, C_out=16, K=8, stride=4, T=300, tile_n=128,
             dtype=jnp.bfloat16, atol=5e-2, rtol=5e-2)

    print("KERNEL_OK")
</pallas_src>

<mosaic_0001>
module attributes {stable_mosaic.version = 11 : i64} {
  func.func @_convt_kernel(%arg0: i32, %arg1: i32, %arg2: memref<1x4x16xf32, #tpu.memory_space<vmem>>, %arg3: memref<1x4x16xf32, #tpu.memory_space<vmem>>, %arg4: memref<2x16x4xf32, #tpu.memory_space<vmem>>, %arg5: memref<32x32xf32, #tpu.memory_space<vmem>>, %arg6: memref<8x1xf32, #tpu.memory_space<vmem>>, %arg7: memref<1x8x32xf32, #tpu.memory_space<vmem>>) attributes {dimension_semantics = [#tpu.dimension_semantics<parallel>, #tpu.dimension_semantics<parallel>], iteration_bounds = array<i64: 2, 1>, scalar_prefetch = 0 : i64, scratch_operands = 0 : i64, tpu.core_type = #tpu.core_type<tc>, window_params = [{transform_indices = @transform_0, window_bounds = array<i64: 1, 4, 16>}, {transform_indices = @transform_1, window_bounds = array<i64: 1, 4, 16>}, {pipeline_mode = #tpu.pipeline_mode<synchronous>, transform_indices = @transform_2, window_bounds = array<i64: 2, 16, 4>}, {pipeline_mode = #tpu.pipeline_mode<synchronous>, transform_indices = @transform_3, window_bounds = array<i64: 32, 32>}, {pipeline_mode = #tpu.pipeline_mode<synchronous>, transform_indices = @transform_4, window_bounds = array<i64: 8, 1>}, {transform_indices = @transform_5, window_bounds = array<i64: 1, 8, 32>}]} {
    %c0 = arith.constant 0 : index
    %c0_0 = arith.constant 0 : index
    %c0_1 = arith.constant 0 : index
    %0 = vector.load %arg2[%c0, %c0_0, %c0_1] : memref<1x4x16xf32, #tpu.memory_space<vmem>>, vector<1x4x16xf32>
    %1 = vector.shape_cast %0 : vector<1x4x16xf32> to vector<4x16xf32>
    %c0_2 = arith.constant 0 : index
    %c0_3 = arith.constant 0 : index
    %c0_4 = arith.constant 0 : index
    %2 = vector.load %arg4[%c0_2, %c0_3, %c0_4] : memref<2x16x4xf32, #tpu.memory_space<vmem>>, vector<1x16x4xf32>
    %3 = vector.shape_cast %2 : vector<1x16x4xf32> to vector<16x4xf32>
    %cst = arith.constant dense<0.000000e+00> : vector<16x16xf32>
    %4 = tpu.matmul %3, %1, %cst {dimension_numbers = #tpu.dot_dimension_numbers<[1], [0], [0], [1], [0, 0, 1, 1], [], []>} : vector<16x4xf32>, vector<4x16xf32>, vector<16x16xf32> -> vector<16x16xf32>
    %c0_5 = arith.constant 0 : index
    %c0_6 = arith.constant 0 : index
    %c0_7 = arith.constant 0 : index
    %5 = vector.load %arg3[%c0_5, %c0_6, %c0_7] : memref<1x4x16xf32, #tpu.memory_space<vmem>>, vector<1x4x16xf32>
    %6 = vector.shape_cast %5 : vector<1x4x16xf32> to vector<4x16xf32>
    %c0_i32 = arith.constant 0 : i32
    %7 = arith.cmpi sgt, %arg1, %c0_i32 : i32
    %cst_8 = arith.constant 0.000000e+00 : f32
    %8 = vector.broadcast %cst_8 : f32 to vector<4x16xf32>
    %9 = arith.select %7, %6, %8 : vector<4x16xf32>
    %10 = tpu.concatenate %9, %1 in 1 : vector<4x16xf32>, vector<4x16xf32> -> vector<4x32xf32>
    %c1 = arith.constant 1 : index
    %c0_9 = arith.constant 0 : index
    %c0_10 = arith.constant 0 : index
    %11 = vector.load %arg4[%c1, %c0_9, %c0_10] : memref<2x16x4xf32, #tpu.memory_space<vmem>>, vector<1x16x4xf32>
    %12 = vector.shape_cast %11 : vector<1x16x4xf32> to vector<16x4xf32>
    %13 = vector.extract_strided_slice %10 {offsets = [0, 15], sizes = [4, 16], strides = [1, 1]} : vector<4x32xf32> to vector<4x16xf32>
    %cst_11 = arith.constant dense<0.000000e+00> : vector<16x16xf32>
    %14 = tpu.matmul %12, %13, %cst_11 {dimension_numbers = #tpu.dot_dimension_numbers<[1], [0], [0], [1], [0, 0, 1, 1], [], []>} : vector<16x4xf32>, vector<4x16xf32>, vector<16x16xf32> -> vector<16x16xf32>
    %15 = arith.addf %4, %14 : vector<16x16xf32>
    %c0_12 = arith.constant 0 : index
    %c0_13 = arith.constant 0 : index
    %16 = vector.load %arg6[%c0_12, %c0_13] : memref<8x1xf32, #tpu.memory_space<vmem>>, vector<8x1xf32>
    %c0_14 = arith.constant 0 : index
    %c0_15 = arith.constant 0 : index
    %17 = vector.load %arg5[%c0_14, %c0_15] : memref<32x32xf32, #tpu.memory_space<vmem>>, vector<32x32xf32>
    %18 = vector.extract_strided_slice %15 {offsets = [0, 0], sizes = [8, 16], strides = [1, 1]} : vector<16x16xf32> to vector<8x16xf32>
    %19 = vector.extract_strided_slice %15 {offsets = [8, 0], sizes = [8, 16], strides = [1, 1]} : vector<16x16xf32> to vector<8x16xf32>
    %20 = tpu.concatenate %18, %19 in 1 : vector<8x16xf32>, vector<8x16xf32> -> vector<8x32xf32>
    %cst_16 = arith.constant dense<0.000000e+00> : vector<8x32xf32>
    %21 = tpu.matmul %20, %17, %cst_16 {dimension_numbers = #tpu.dot_dimension_numbers<[1], [0], [0], [1], [0, 0, 1, 1], [], []>} : vector<8x32xf32>, vector<32x32xf32>, vector<8x32xf32> -> vector<8x32xf32>
    %22 = vector.broadcast %16 : vector<8x1xf32> to vector<8x32xf32>
    %23 = arith.addf %21, %22 : vector<8x32xf32>
    %c0_17 = arith.constant 0 : index
    %c0_18 = arith.constant 0 : index
    %c0_19 = arith.constant 0 : index
    %24 = vector.load %arg7[%c0_17, %c0_18, %c0_19] : memref<1x8x32xf32, #tpu.memory_space<vmem>>, vector<1x8x32xf32>
    %25 = vector.shape_cast %24 : vector<1x8x32xf32> to vector<8x32xf32>
    %26 = vector.shape_cast %23 : vector<8x32xf32> to vector<1x8x32xf32>
    tpu.vector_store %arg7[%c0_17, %c0_18, %c0_19], %26 {strides = array<i32>} : memref<1x8x32xf32, #tpu.memory_space<vmem>>, vector<1x8x32xf32>,
    return
  }
  func.func @transform_0(%arg0: i32, %arg1: i32) -> (i32, i32, i32) {
    %c0_i32 = arith.constant 0 : i32
    %c0_i32_0 = arith.constant 0 : i32
    return %arg0, %c0_i32, %arg1 : i32, i32, i32
  }
  func.func @transform_1(%arg0: i32, %arg1: i32) -> (i32, i32, i32) {
    %c1_i32 = arith.constant 1 : i32
    %0 = arith.muli %arg1, %c1_i32 : i32
    %c1_i32_0 = arith.constant 1 : i32
    %1 = arith.subi %0, %c1_i32_0 : i32
    %c0_i32 = arith.constant 0 : i32
    %2 = arith.maxsi %1, %c0_i32 : i32
    %c0_i32_1 = arith.constant 0 : i32
    %c0_i32_2 = arith.constant 0 : i32
    return %arg0, %c0_i32_1, %2 : i32, i32, i32
  }
  func.func @transform_2(%arg0: i32, %arg1: i32) -> (i32, i32, i32) {
    %c0_i32 = arith.constant 0 : i32
    %c0_i32_0 = arith.constant 0 : i32
    %c0_i32_1 = arith.constant 0 : i32
    %c0_i32_2 = arith.constant 0 : i32
    return %c0_i32, %c0_i32_0, %c0_i32_1 : i32, i32, i32
  }
  func.func @transform_3(%arg0: i32, %arg1: i32) -> (i32, i32) {
    %c0_i32 = arith.constant 0 : i32
    %c0_i32_0 = arith.constant 0 : i32
    %c0_i32_1 = arith.constant 0 : i32
    return %c0_i32, %c0_i32_0 : i32, i32
  }
  func.func @transform_4(%arg0: i32, %arg1: i32) -> (i32, i32) {
    %c0_i32 = arith.constant 0 : i32
    %c0_i32_0 = arith.constant 0 : i32
    %c0_i32_1 = arith.constant 0 : i32
    return %c0_i32, %c0_i32_0 : i32, i32
  }
  func.func @transform_5(%arg0: i32, %arg1: i32) -> (i32, i32, i32) {
    %c0_i32 = arith.constant 0 : i32
    %c0_i32_0 = arith.constant 0 : i32
    return %arg0, %c0_i32, %arg1 : i32, i32, i32
  }
}

</mosaic_0001>

<bundles_post_ra>
// kernel: tpu_custom_call.1
= control target key start
LH: loop header
LB: loop body
LE: loop exit
PB: predicated region body
PF: predicated region fallthrough
CT: control target
= control target key end

     0   :  { %10 = vsyncpa [#allocation3], 0  ;;  %s850_s0 = inlined_call_operand.vmem [shape: f32[2,4,16], index: 0, kind: input, shape index: {}]   ;;  %s851_s1 = inlined_call_operand.vmem [shape: f32[2,4,16], index: 1, kind: input, shape index: {}]   ;;  %s852_s2 = inlined_call_operand.vmem [shape: f32[2,16,4], index: 2, kind: input, shape index: {}]   ;;  %s853_s3 = inlined_call_operand.vmem [shape: f32[32,32], index: 3, kind: input, shape index: {}]   ;;  %s854_s4 = inlined_call_operand.vmem [shape: f32[8,1], index: 4, kind: input, shape index: {}]   ;;  %s855_s5 = inlined_call_operand.hbm [shape: f32[2,8,32], index: 5, kind: output, shape index: {}]  }
   0x1   :  { %12 = vsyncpa [#allocation3 + $0x1], 0  ;;  %s717_s18 = smov 0   ;;  %s719_s19 = smov 0  }
   0x2   :  { %s721_s20 = smov 0   ;;  %s723_s1 = smov 0  }
   0x3   :  { %s725_s21 = smov 0   ;;  %s727_s22 = smov 0  }
   0x4 LB: > { %s522_s23 = sadd.s32 4294967295, %s682_s22   ;;  %s523_s24 = sadd.s32 4294967294, %s682_s22   ;;  %s682_s22 = sphi %s727_s22, %s18_s22   ;;  %s678_s21 = sphi %s725_s21, %s862_s21   ;;  %s674_s1 = sphi %s723_s1, %s861_s1   ;;  %s670_s20 = sphi %s721_s20, %s860_s20   ;;  %s666_s19 = sphi %s719_s19, %s859_s19   ;;  %s662_s18 = sphi %s717_s18, %s858_s18  }
   0x5   : > { %s30_s25 = sadd.s32 1, %s678_s21  ;;  %s164_s26 = sadd.s32 1, %s670_s20 }
   0x6   : > { %p32_p0 = scmp.ge.s32.totalorder %s30_s25, 2  ;;  %p174_p1 = scmp.ne.s32.totalorder %s670_s20, %s666_s19 }
   0x7   : > { %p175_p2 = scmp.eq.s32.totalorder %s522_s23, 1  ;;  %p180_p3 = scmp.ne.s32.totalorder %s666_s19, %s662_s18 }
   0x8   : > { %s864_s25 = smov (%p32_p0, %s30_s25), 0  ;;  %p181_p5 = scmp.eq.s32.totalorder %s523_s24, 1 }
   0x9   : > { %p757_p4 = por %p175_p2, %p174_p1  ;;  %s159_s28 = ssub.s32 %s678_s21, %s864_s25 }
   0xa   : > { %p526_p6 = scmp.ge.s32.totalorder %s682_s22, 1  ;;  %p162_p7 = scmp.eq.s32.totalorder %s159_s28, 0 }
   0xb   : > { %p764_p8 = por %p181_p5, %p180_p3  ;;  %p234_p9 = scmp.lt.s32.totalorder %s682_s22, 3 }
   0xc   : > { %s770_s30 = scalar_select %p162_p7, %s670_s20, %s164_s26  }
   0xd   : > { %p235_p10 = pnand %p526_p6, %p234_p9 }
   0xe   : > { %p274_p11 = scmp.lt.s32.totalorder (!%p235_p10), %s674_s1, 1  ;;  %s684_s11 = smov (!%p235_p10), 16  }
   0xf   : > { %238 = sbr.rel (%p235_p10) target bundleno = 644 (0x284), region = 40  ;;  %s685_s12 = smov (!%p235_p10), 113  }
  0x10   : > { %s540_s17 = sshll.u32 (!%p235_p10), %s674_s1, 3  ;;  %s624_s13 = scalar_lea.hbm (!%p235_p10), %s855_s5, 16 }
  0x11   : > { %s431_s26 = scalar_lea.hbm (!%p235_p10), %s855_s5, %s540_s17 }
  0x14   : > { %s275_s6 = scalar_select %p274_p11, %s674_s1, 1  ;;  %vm322_vm0 = vcmask 1043456   ;;  %vm307_vm1 = vcmask 130048   ;;  %v295_v3 = vld [vmem:[%s852_s2] sm:$0xff]  ;;  %vm315_vm2 = vcmask 31744   ;;  %v296_v4 = vld [vmem:[%s852_s2 + $0x8] sm:$0xff] }
  0x15   : > { %v530_v5 = vld [vmem:[%s852_s2 + $0x10] sm:$0xff]  ;;  %v531_v6 = vld [vmem:[%s852_s2 + $0x18] sm:$0xff]  ;;  %v381_v10 = vld [vmem:[%s853_s3 + $0x8] sm:$0xff]  ;;  %v686_v17 = vmov 0   ;;  %vm394_vm3 = vcmask 261120  }
  0x16   : > { %s528_s7 = sshll.u32 %s275_s6, 2  ;;  %v383_v8 = vld [vmem:[%s853_s3 + $0x18] sm:$0xff]  ;;  %v382_v9 = vld [vmem:[%s853_s3 + $0x10] sm:$0xff]  ;;  %v380_v15 = vld [vmem:[%s853_s3] sm:$0xff]  ;;  %602 = vset.pattern.permute.xlu1 %v686_v17  ;;  %603 = vset.pattern.permute.xlu0 %v686_v17 }
  0x17   : > { %s280_s10 = scalar_lea.vmem %s850_s0, %s528_s7  ;;  %410 = vmatpush.msra.mxu2 %v383_v8  ;;  %v379_v16 = vld [vmem:[%s854_s4] sm:$0xff]  ;;  %s435_s7 = sshll.u32 %s431_s26, 4  ;;  %s436_s7 = int_to_ptr.hbm [resolvable:$true] %s435_s7 }
  0x18   : > { %v294_v0 = vld [vmem:[%s280_s10] sm:$0xf]  ;;  %s618_s9 = sshra.s32 %s436_s7, 4  ;;  %s619_s9 = int_to_ptr.hbm [resolvable:$true] %s618_s9 }
  0x19   : > { %304 = vrot.lane.b32.xlu0 %v294_v0, %s684_s11  ;;  %535 = vmatpush.msk.msra.mxu1 %vm322_vm0, %v294_v0  ;;  %s620_s10 = scalar_lea.hbm %s619_s9, 8  ;;  %p625_p1 = scmp.lt.s32.totalorder %s619_s9, %s855_s5 }
  0x1a   : > { %536 = vmatmul.msk.f32.vlgmr.msra.gmra.mxu1 %vm315_vm2, %v295_v3  ;;  %411 = vmatpush.msra.mxu2 %v382_v9  ;;  %p621_p12 = scmp.ne.s32.totalorder %s619_s9, %s620_s10  ;;  %p626_p2 = scmp.lt.s32.totalorder %s624_s13, %s620_s10 }
  0x1c   : > { %412 = vmatpush.msra.mxu2 %v381_v10  ;;  %p622_p13 = pnand %p621_p12, %p757_p4  ;;  %p627_p3 = por %p626_p2, %p625_p1 }
  0x1e   : > { %413 = vmatpush.msra.mxu2 %v380_v15  ;;  %p623_p0 = pneg %p622_p13 }
  0x20   : > { %p628_p5 = pnand %p627_p3, %p623_p0 }
  0x22   : > { %537 = vmatmul.msk.f32.gmra.mxu1 %vm315_vm2, %v296_v4 }
  0x8b   : > { %v305_v1 = vpop.permute.xlu0 %304 }
  0x8c   : > { %v308_v2 = vsel %vm307_vm1, 0.0, %v305_v1 }
  0x8d   : > { %313 = vrot.lane.b32.xlu0 %v308_v2, %s685_s12 }
  0x97   : > { %v373_v11 = vpop.f32.mrf.mxu1 }
  0x9f   : > { %v376_v12 = vpop.f32.mrf.mxu1 }
  0xff   : > { %v314_v7 = vpop.permute.xlu0 %313 }
 0x100   : > { %532 = vmatpush.msk.msra.mxu0 %vm322_vm0, %v314_v7  ;;  %543 = vmatpush.msk.msra.mxu3 %vm322_vm0, %v314_v7 }
 0x101   : > { %533 = vmatmul.msk.f32.vlgmr.msra.gmra.mxu0 %vm315_vm2, %v530_v5  ;;  %534 = vmatmul.msk.f32.vlgmr.msra.gmra.mxu3 %vm315_vm2, %v531_v6 }
 0x17e   : > { %v342_v18 = vpop.f32.mrf.mxu0 }
 0x17f   : > { %v374_v19 = vadd.f32 %v373_v11, %v342_v18 }
 0x184   : > { %v345_v13 = vpop.f32.mrf.mxu3 }
 0x185   : > { %v377_v14 = vadd.f32 %v376_v12, %v345_v13 }
 0x187   : > { %385 = vrot.lane.b32.xlu1 %v377_v14, %s684_s11  ;;  %s271_s11 = sand.u32 1, %s666_s19  }
 0x188   : > { %s527_s16 = sshll.u32 %s271_s11, 3  ;;  %s420_s8 = scalar_lea.sflag [#allocation3], %s271_s11 }
 0x189   : > { %s273_s28 = scalar_lea.vmem [#allocation2], %s527_s16 }
 0x18a   : > { %s433_s6 = sshll.u32 %s273_s28, 4  ;;  %s434_s6 = int_to_ptr.vmem [resolvable:$true] %s433_s6 }
 0x18f   : > { %391 = vperm.xlu1 %602, %v379_v16  }
 0x1f9   : > { %v386_v20 = vpop.permute.xlu1 %385 }
 0x1fa   : > { %v388_v21 = vsel %vm307_vm1, %v374_v19, %v386_v20 }
 0x1fb   : > { %538 = vmatmul.msk.f32.vlgmr.msra.gmra.mxu2 %vm394_vm3, %v388_v21 }
 0x201   : > { %v392_v22 = vpop.permute.xlu1 %391 }
 0x27e   : > { %v415_v23 = vpop.f32.mrf.mxu2 }
 0x27f   : > { %v416_v24 = vadd.f32 %v415_v23, %v392_v22 }
 0x281   : > { %418 = vst.msk [vmem:[%s273_s28] sm:$0xff] %vm394_vm3, %v416_v24 }
 0x282   : > { %631 = shalt.err (!%p628_p5)
}
 0x283   : > { %544 = dma.vmem_to_hbm [thread:$0]  (%p757_p4), %s434_s6, 128, %s436_s7, %s420_s8  }
 0x284 PF: > { %p550_p6 = scmp.ge.s32.totalorder %s682_s22, 2  ;;  %s447_s11 = sand.u32 1, %s662_s18  }
 0x285   : > { %s448_s16 = scalar_lea.sflag [#allocation3], %s447_s11 }
 0x286   : > { %p547_p7 = pnand %p550_p6, %p764_p8 }
 0x288   : > { %p548_p9 = pneg %p547_p7 }
 0x28a   : > { %657 = dma.done.wait (%p548_p9), %s448_s16, 128  }
 0x28b   : > { %659 = vsyncadd (%p548_p9), %s448_s16, 4294967168  ;;  %s18_s22 = sadd.s32 1, %s682_s22   ;;  %s858_s18 = smov %s666_s19 }
 0x28c   : > { %p15_p10 = scmp.ge.s32.totalorder %s18_s22, 4   ;;  %s859_s19 = smov %s670_s20 }
 0x28d   : > { %s860_s20 = smov %s770_s30  ;;  %s861_s1 = smov %s678_s21 }
 0x28e   : > { %s862_s21 = smov %s864_s25  ;;  %17 = sbr.rel (!%p15_p10) target bundleno = 4 (0x4), region = 79 }
 0x293   :  { %454 = vsyncpa [#allocation3], 1 }
 0x294   :  { %456 = vsyncpa [#allocation3 + $0x1], 1 }

</bundles_post_ra>
